<compile_context>
chip_gen: v7x
topology: tpu7x:2x2x1
jax: 0.10.0
libtpu: 0.0.40
codegen_flags: <defaults>
</compile_context>

<pallas_src>
import jax
import jax.numpy as jnp
from jax.experimental import pallas as pl
from jax.experimental.pallas import tpu as pltpu


def _ceil_to(a, m):
    return -(-a // m) * m


def _node_attention_kernel(x_ref, p_ref, w1_ref, b1_ref, w2_ref, b2_ref, e_ref,
                           o_ref):
    # x_ref / o_ref : (TB, C*N)  flat channel-major rows; lane index = c*N + n
    # p_ref  : (C*N, C)   avg-pool-over-nodes matrix   (1/N at [c*N+n, c])
    # w1_ref : (C, C//4)  b1_ref: (1, C//4)
    # w2_ref : (C//4, N)  b2_ref: (1, N)
    # e_ref  : (N, C*N)   gate-broadcast matrix        (1   at [n, c*N+n])
    x = x_ref[...].astype(jnp.float32)                                    # (TB, C*N)

    # AdaptiveAvgPool1d(1) as an MXU matmul (keeps lanes dense, no strided access).
    pooled = jnp.dot(x, p_ref[...], preferred_element_type=jnp.float32)   # (TB, C)

    # Squeeze MLP (tiny GEMMs: MXU padding waste is filler under HBM slack).
    h = jnp.dot(pooled, w1_ref[...], preferred_element_type=jnp.float32)
    h = jnp.maximum(h + b1_ref[...], 0.0)                                 # (TB, C//4)
    s = jnp.dot(h, w2_ref[...], preferred_element_type=jnp.float32)
    gate = 1.0 + jax.nn.sigmoid(s + b2_ref[...])                          # (TB, N)

    # Broadcast the per-node gate to every channel group via the MXU, then a
    # single dense VALU multiply per element:  out = x + x*s == x * (1 + s).
    gate_flat = jnp.dot(gate, e_ref[...], preferred_element_type=jnp.float32)
    o_ref[...] = (x * gate_flat).astype(o_ref.dtype)


def node_attention(x, w1, b1, w2, b2, *, tb_max=None):
    """x: (B, C, N). Weights stored (in, out): w1 (C, C//4), w2 (C//4, N);
    biases as (1, out)."""
    B, C, N = x.shape
    CN = C * N
    elem = jnp.dtype(x.dtype).itemsize
    cn_pad = _ceil_to(CN, 128)

    # Free, layout-preserving flatten of a row-major array: (B, C, N) -> (B, C*N).
    x_flat = x.reshape(B, CN)

    # Structural matrices (exact 0 / 1 / 1/N entries; VMEM-resident across grid).
    pool_mat = jnp.repeat(jnp.eye(C, dtype=jnp.float32), N, axis=0) / N    # (C*N, C)
    bcast_mat = jnp.tile(jnp.eye(N, dtype=jnp.float32), (1, C))            # (N, C*N)

    # ---- batch-tile sizing ---------------------------------------------------
    # Per batch row: 2x double-buffered input + 2x output blocks (input dtype)
    # plus ~3 f32 temporaries (x_f32, gate_flat, product) inside the body.
    per_row = 4 * cn_pad * elem + 3 * cn_pad * 4
    tb = int(max(8, (24 << 20) // per_row))
    tb = min(tb, 1024)                 # 1024-row f32 blocks already sit at the roofline plateau
    if tb_max is not None:
        tb = min(tb, tb_max)
    if tb >= B:
        tb = B                         # full extent (any value is legal)
    else:
        tb = max(8, (tb // 8) * 8)     # keep the sublane dim 8-aligned
    grid = (pl.cdiv(B, tb),)

    tb_pad = _ceil_to(tb, 8)
    blk_bytes = tb_pad * cn_pad * elem
    tmp_bytes = 3 * tb_pad * cn_pad * 4
    w_bytes = 4 * (
        _ceil_to(CN, 8) * _ceil_to(C, 128)          # pool_mat
        + _ceil_to(C, 8) * _ceil_to(C // 4, 128)    # w1
        + 8 * _ceil_to(C // 4, 128)                 # b1
        + _ceil_to(C // 4, 8) * _ceil_to(N, 128)    # w2
        + 8 * _ceil_to(N, 128)                      # b2
        + _ceil_to(N, 8) * cn_pad                   # bcast_mat
    )
    vmem_limit = int(min(max(4 * blk_bytes + tmp_bytes + 2 * w_bytes + (2 << 20),
                             16 << 20),
                         48 << 20))

    flops = int(2 * B * CN * C            # pooling matmul
                + 2 * B * C * (C // 4)    # squeeze linear 1
                + 2 * B * (C // 4) * N    # squeeze linear 2
                + 2 * B * N * CN          # gate-broadcast matmul
                + B * CN)                 # elementwise gating
    bytes_accessed = int(2 * B * CN * elem
                         + 4 * (pool_mat.size + bcast_mat.size
                                + w1.size + b1.size + w2.size + b2.size))

    out_flat = pl.pallas_call(
        _node_attention_kernel,
        out_shape=jax.ShapeDtypeStruct((B, CN), x.dtype),
        grid=grid,
        in_specs=[
            pl.BlockSpec((tb, CN), lambda i: (i, 0)),
            pl.BlockSpec(pool_mat.shape, lambda i: (0, 0)),   # resident across grid
            pl.BlockSpec(w1.shape, lambda i: (0, 0)),
            pl.BlockSpec(b1.shape, lambda i: (0, 0)),
            pl.BlockSpec(w2.shape, lambda i: (0, 0)),
            pl.BlockSpec(b2.shape, lambda i: (0, 0)),
            pl.BlockSpec(bcast_mat.shape, lambda i: (0, 0)),
        ],
        out_specs=pl.BlockSpec((tb, CN), lambda i: (i, 0)),
        compiler_params=pltpu.CompilerParams(
            dimension_semantics=("parallel",),                # shard batch tiles on v7x
            vmem_limit_bytes=vmem_limit,
        ),
        cost_estimate=pl.CostEstimate(
            flops=flops,
            transcendentals=int(B * N),
            bytes_accessed=bytes_accessed,
        ),
    )(x_flat, pool_mat, w1, b1, w2, b2, bcast_mat)

    # Free reshape back to the PyTorch (B, C, N) layout.
    return out_flat.reshape(B, C, N)


def node_attention_ref(x, w1, b1, w2, b2):
    """Pure-JAX reference of the PyTorch forward (x: (B, C, N))."""
    hi = jax.lax.Precision.HIGHEST
    pooled = jnp.mean(x, axis=-1)                                       # (B, C)
    h = jnp.maximum(jnp.dot(pooled, w1, precision=hi) + b1, 0.0)        # (B, C//4)
    s = jax.nn.sigmoid(jnp.dot(h, w2, precision=hi) + b2)               # (B, N)
    return x + x * s[:, None, :]


if __name__ == "__main__":
    import numpy as np

    B, C, N = 16, 64, 12          # 12 nodes is fixed by the module's second Linear
    key = jax.random.PRNGKey(0)
    kx, k1, k2, k3, k4 = jax.random.split(key, 5)

    x = jax.random.normal(kx, (B, C, N), dtype=jnp.float32)

    # PyTorch Linear stores weight as (out, in); here kept pre-transposed (in, out).
    w1 = jax.random.normal(k1, (C, C // 4), dtype=jnp.float32) * (1.0 / jnp.sqrt(C))
    b1 = jax.random.normal(k2, (1, C // 4), dtype=jnp.float32) * 0.1
    w2 = jax.random.normal(k3, (C // 4, N), dtype=jnp.float32) * (1.0 / jnp.sqrt(C // 4))
    b2 = jax.random.normal(k4, (1, N), dtype=jnp.float32) * 0.1

    # tb_max=8 -> batch tile of 8 rows, grid of 2 steps (exercises the DMA pipeline).
    out = node_attention(x, w1, b1, w2, b2, tb_max=8)
    out = jax.block_until_ready(out)

    ref = node_attention_ref(x, w1, b1, w2, b2)
    # Tolerance absorbs MXU multi-pass f32 rounding from the reordered
    # (matmul-based) pooling / broadcast; any semantic bug would be >=1e-2 off.
    np.testing.assert_allclose(np.asarray(out), np.asarray(ref), rtol=1e-3, atol=1e-3)

    print("KERNEL_OK")
</pallas_src>

<mosaic_0001>
module attributes {stable_mosaic.version = 11 : i64} {
  func.func @_node_attention_kernel(%arg0: i32, %arg1: memref<8x768xf32, #tpu.memory_space<vmem>>, %arg2: memref<768x64xf32, #tpu.memory_space<vmem>>, %arg3: memref<64x16xf32, #tpu.memory_space<vmem>>, %arg4: memref<1x16xf32, #tpu.memory_space<vmem>>, %arg5: memref<16x12xf32, #tpu.memory_space<vmem>>, %arg6: memref<1x12xf32, #tpu.memory_space<vmem>>, %arg7: memref<12x768xf32, #tpu.memory_space<vmem>>, %arg8: memref<8x768xf32, #tpu.memory_space<vmem>>) attributes {dimension_semantics = [#tpu.dimension_semantics<parallel>], iteration_bounds = array<i64: 2>, scalar_prefetch = 0 : i64, scratch_operands = 0 : i64, tpu.core_type = #tpu.core_type<tc>, window_params = [{transform_indices = @transform_0, window_bounds = array<i64: 8, 768>}, {pipeline_mode = #tpu.pipeline_mode<synchronous>, transform_indices = @transform_1, window_bounds = array<i64: 768, 64>}, {pipeline_mode = #tpu.pipeline_mode<synchronous>, transform_indices = @transform_2, window_bounds = array<i64: 64, 16>}, {pipeline_mode = #tpu.pipeline_mode<synchronous>, transform_indices = @transform_3, window_bounds = array<i64: 1, 16>}, {pipeline_mode = #tpu.pipeline_mode<synchronous>, transform_indices = @transform_4, window_bounds = array<i64: 16, 12>}, {pipeline_mode = #tpu.pipeline_mode<synchronous>, transform_indices = @transform_5, window_bounds = array<i64: 1, 12>}, {pipeline_mode = #tpu.pipeline_mode<synchronous>, transform_indices = @transform_6, window_bounds = array<i64: 12, 768>}, {transform_indices = @transform_7, window_bounds = array<i64: 8, 768>}]} {
    %c0 = arith.constant 0 : index
    %c0_0 = arith.constant 0 : index
    %0 = vector.load %arg1[%c0, %c0_0] : memref<8x768xf32, #tpu.memory_space<vmem>>, vector<8x768xf32>
    %c0_1 = arith.constant 0 : index
    %c0_2 = arith.constant 0 : index
    %1 = vector.load %arg2[%c0_1, %c0_2] : memref<768x64xf32, #tpu.memory_space<vmem>>, vector<768x64xf32>
    %cst = arith.constant dense<0.000000e+00> : vector<8x64xf32>
    %2 = tpu.matmul %0, %1, %cst {dimension_numbers = #tpu.dot_dimension_numbers<[1], [0], [0], [1], [0, 0, 1, 1], [], []>} : vector<8x768xf32>, vector<768x64xf32>, vector<8x64xf32> -> vector<8x64xf32>
    %c0_3 = arith.constant 0 : index
    %c0_4 = arith.constant 0 : index
    %3 = vector.load %arg3[%c0_3, %c0_4] : memref<64x16xf32, #tpu.memory_space<vmem>>, vector<64x16xf32>
    %cst_5 = arith.constant dense<0.000000e+00> : vector<8x16xf32>
    %4 = tpu.matmul %2, %3, %cst_5 {dimension_numbers = #tpu.dot_dimension_numbers<[1], [0], [0], [1], [0, 0, 1, 1], [], []>} : vector<8x64xf32>, vector<64x16xf32>, vector<8x16xf32> -> vector<8x16xf32>
    %c0_6 = arith.constant 0 : index
    %c0_7 = arith.constant 0 : index
    %5 = vector.load %arg4[%c0_6, %c0_7] : memref<1x16xf32, #tpu.memory_space<vmem>>, vector<1x16xf32>
    %6 = vector.broadcast %5 : vector<1x16xf32> to vector<8x16xf32>
    %7 = arith.addf %4, %6 : vector<8x16xf32>
    %cst_8 = arith.constant 0.000000e+00 : f32
    %8 = vector.broadcast %cst_8 : f32 to vector<8x16xf32>
    %9 = arith.maximumf %7, %8 : vector<8x16xf32>
    %c0_9 = arith.constant 0 : index
    %c0_10 = arith.constant 0 : index
    %10 = vector.load %arg5[%c0_9, %c0_10] : memref<16x12xf32, #tpu.memory_space<vmem>>, vector<16x12xf32>
    %cst_11 = arith.constant dense<0.000000e+00> : vector<8x12xf32>
    %11 = tpu.matmul %9, %10, %cst_11 {dimension_numbers = #tpu.dot_dimension_numbers<[1], [0], [0], [1], [0, 0, 1, 1], [], []>} : vector<8x16xf32>, vector<16x12xf32>, vector<8x12xf32> -> vector<8x12xf32>
    %c0_12 = arith.constant 0 : index
    %c0_13 = arith.constant 0 : index
    %12 = vector.load %arg6[%c0_12, %c0_13] : memref<1x12xf32, #tpu.memory_space<vmem>>, vector<1x12xf32>
    %13 = vector.broadcast %12 : vector<1x12xf32> to vector<8x12xf32>
    %14 = arith.addf %11, %13 : vector<8x12xf32>
    %15 = arith.negf %14 : vector<8x12xf32>
    %16 = math.exp %15 : vector<8x12xf32>
    %cst_14 = arith.constant 1.000000e+00 : f32
    %17 = vector.broadcast %cst_14 : f32 to vector<8x12xf32>
    %18 = arith.addf %17, %16 : vector<8x12xf32>
    %19 = arith.divf %17, %18 : vector<8x12xf32>
    %cst_15 = arith.constant 1.000000e+00 : f32
    %20 = vector.broadcast %cst_15 : f32 to vector<8x12xf32>
    %21 = arith.addf %20, %19 : vector<8x12xf32>
    %c0_16 = arith.constant 0 : index
    %c0_17 = arith.constant 0 : index
    %22 = vector.load %arg7[%c0_16, %c0_17] : memref<12x768xf32, #tpu.memory_space<vmem>>, vector<12x768xf32>
    %cst_18 = arith.constant dense<0.000000e+00> : vector<8x768xf32>
    %23 = tpu.matmul %21, %22, %cst_18 {dimension_numbers = #tpu.dot_dimension_numbers<[1], [0], [0], [1], [0, 0, 1, 1], [], []>} : vector<8x12xf32>, vector<12x768xf32>, vector<8x768xf32> -> vector<8x768xf32>
    %24 = arith.mulf %0, %23 : vector<8x768xf32>
    %c0_19 = arith.constant 0 : index
    %c0_20 = arith.constant 0 : index
    %25 = vector.load %arg8[%c0_19, %c0_20] : memref<8x768xf32, #tpu.memory_space<vmem>>, vector<8x768xf32>
    tpu.vector_store %arg8[%c0_19, %c0_20], %24 {strides = array<i32>} : memref<8x768xf32, #tpu.memory_space<vmem>>, vector<8x768xf32>,
    return
  }
  func.func @transform_0(%arg0: i32) -> (i32, i32) {
    %c0_i32 = arith.constant 0 : i32
    %c0_i32_0 = arith.constant 0 : i32
    return %arg0, %c0_i32 : i32, i32
  }
  func.func @transform_1(%arg0: i32) -> (i32, i32) {
    %c0_i32 = arith.constant 0 : i32
    %c0_i32_0 = arith.constant 0 : i32
    %c0_i32_1 = arith.constant 0 : i32
    return %c0_i32, %c0_i32_0 : i32, i32
  }
  func.func @transform_2(%arg0: i32) -> (i32, i32) {
    %c0_i32 = arith.constant 0 : i32
    %c0_i32_0 = arith.constant 0 : i32
    %c0_i32_1 = arith.constant 0 : i32
    return %c0_i32, %c0_i32_0 : i32, i32
  }
  func.func @transform_3(%arg0: i32) -> (i32, i32) {
    %c0_i32 = arith.constant 0 : i32
    %c0_i32_0 = arith.constant 0 : i32
    %c0_i32_1 = arith.constant 0 : i32
    return %c0_i32, %c0_i32_0 : i32, i32
  }
  func.func @transform_4(%arg0: i32) -> (i32, i32) {
    %c0_i32 = arith.constant 0 : i32
    %c0_i32_0 = arith.constant 0 : i32
    %c0_i32_1 = arith.constant 0 : i32
    return %c0_i32, %c0_i32_0 : i32, i32
  }
  func.func @transform_5(%arg0: i32) -> (i32, i32) {
    %c0_i32 = arith.constant 0 : i32
    %c0_i32_0 = arith.constant 0 : i32
    %c0_i32_1 = arith.constant 0 : i32
    return %c0_i32, %c0_i32_0 : i32, i32
  }
  func.func @transform_6(%arg0: i32) -> (i32, i32) {
    %c0_i32 = arith.constant 0 : i32
    %c0_i32_0 = arith.constant 0 : i32
    %c0_i32_1 = arith.constant 0 : i32
    return %c0_i32, %c0_i32_0 : i32, i32
  }
  func.func @transform_7(%arg0: i32) -> (i32, i32) {
    %c0_i32 = arith.constant 0 : i32
    %c0_i32_0 = arith.constant 0 : i32
    return %arg0, %c0_i32 : i32, i32
  }
}

</mosaic_0001>

<bundles_post_ra>
// kernel: tpu_custom_call.1
= control target key start
LH: loop header
LB: loop body
LE: loop exit
PB: predicated region body
PF: predicated region fallthrough
CT: control target
= control target key end

     0   :  { %12 = vsyncpa [#allocation3], 0  ;;  %s2076_s0 = inlined_call_operand.vmem [shape: f32[16,768], index: 0, kind: input, shape index: {}]   ;;  %s2077_s1 = inlined_call_operand.vmem [shape: f32[768,64], index: 1, kind: input, shape index: {}]   ;;  %s2078_s2 = inlined_call_operand.vmem [shape: f32[64,16], index: 2, kind: input, shape index: {}]   ;;  %s2079_s3 = inlined_call_operand.vmem [shape: f32[1,16], index: 3, kind: input, shape index: {}]   ;;  %s2080_s4 = inlined_call_operand.vmem [shape: f32[16,12], index: 4, kind: input, shape index: {}]   ;;  %s2081_s5 = inlined_call_operand.vmem [shape: f32[1,12], index: 5, kind: input, shape index: {}]   ;;  %s2082_s6 = inlined_call_operand.vmem [shape: f32[12,768], index: 6, kind: input, shape index: {}]   ;;  %s2083_s7 = inlined_call_operand.hbm [shape: f32[16,768], index: 7, kind: output, shape index: {}]  }
   0x1   :  { %14 = vsyncpa [#allocation3 + $0x1], 0  ;;  %s1556_s24 = smov 0   ;;  %s1558_s25 = smov 0  }
   0x2   :  { %s1560_s26 = smov 0   ;;  %s1562_s27 = smov 0  }
   0x3 LB: > { %s1577_s28 = sadd.s32 4294967295, %s1509_s27   ;;  %s1103_s29 = sadd.s32 4294967294, %s1509_s27   ;;  %s1509_s27 = sphi %s1562_s27, %s2091_s27   ;;  %s1505_s26 = sphi %s1560_s26, %s2090_s26   ;;  %s1501_s25 = sphi %s1558_s25, %s2089_s25   ;;  %s1497_s24 = sphi %s1556_s24, %s2088_s24  }
   0x4   : > { %s1581_s30 = sadd.s32 1, %s1509_s27   ;;  %s179_s8 = sadd.s32 1, %s1505_s26 }
   0x5   : > { %s176_s9 = ssub.s32 %s1509_s27, %s1581_s30  ;;  %p189_p0 = scmp.ne.s32.totalorder %s1505_s26, %s1501_s25 }
   0x6   : > { %p177_p1 = scmp.eq.s32.totalorder %s176_s9, 0  ;;  %p190_p2 = scmp.eq.s32.totalorder %s1577_s28, 1 }
   0x7   : > { %p195_p3 = scmp.ne.s32.totalorder %s1501_s25, %s1497_s24  ;;  %p196_p4 = scmp.eq.s32.totalorder %s1103_s29, 1 }
   0x8   : > { %s1592_s10 = scalar_select %p177_p1, %s1505_s26, %s179_s8  }
   0x9   : > { %p1594_p5 = por %p190_p2, %p189_p0  ;;  %p1598_p6 = por %p196_p4, %p195_p3 }
   0xa   : > { %p1106_p7 = scmp.ge.s32.totalorder %s1509_s27, 1  ;;  %p240_p8 = scmp.lt.s32.totalorder %s1509_s27, 3 }
   0xc   : > { %p241_p9 = pnand %p1106_p7, %p240_p8 }
   0xd   : > { %v299_v0 = vld [vmem:[%s2077_s1 + $0x80] sm:$0xff] (!%p241_p9)  ;;  %v300_v1 = vld [vmem:[%s2077_s1 + $0x88] sm:$0xff] (!%p241_p9)  ;;  %v301_v11 = vld [vmem:[%s2077_s1 + $0x90] sm:$0xff] (!%p241_p9)  ;;  %p272_p10 = scmp.lt.s32.totalorder (!%p241_p9), %s1577_s28, 1  ;;  %vm1512_vm0 = vmmov (!%p241_p9), 0   ;;  %vm604_vm1 = vcmask (!%p241_p9), 523264  }
   0xe   : > { %244 = sbr.rel (%p241_p9) target bundleno = 993 (0x3e1), region = 48  ;;  %v331_v2 = vld [vmem:[%s2077_s1 + $0x180] sm:$0xff] (!%p241_p9)  ;;  %v1268_v3 = vpack.c.bf16 (!%p241_p9), %v300_v1, %v299_v0  ;;  %v332_v4 = vld [vmem:[%s2077_s1 + $0x188] sm:$0xff] (!%p241_p9)  ;;  %v302_v13 = vld [vmem:[%s2077_s1 + $0x98] sm:$0xff] (!%p241_p9)  ;;  %vm688_vm2 = vcmask (!%p241_p9), 130048   ;;  %vm785_vm3 = vcmask (!%p241_p9), 1043456  }
   0xf   : > { %v283_v5 = vld [vmem:[%s2077_s1] sm:$0xff] (!%p241_p9)  ;;  %v284_v6 = vld [vmem:[%s2077_s1 + $0x8] sm:$0xff] (!%p241_p9)  ;;  %v1300_v7 = vpack.c.bf16 (!%p241_p9), %v332_v4, %v331_v2  ;;  %v333_v14 = vld [vmem:[%s2077_s1 + $0x190] sm:$0xff] (!%p241_p9)  ;;  %v1272_v16 = vpack.c.bf16 (!%p241_p9), %v302_v13, %v301_v11  ;;  %vm1514_vm4 = vmmov (!%p241_p9), 1   ;;  %vm781_vm6 = vcmask (!%p241_p9), 97280   ;;  %s269_s16 = sand.u32 (!%p241_p9), 1, %s1501_s25  }
  0x10   : > { %v1270_v8 = vpack.c.bf16 (!%p241_p9), %v284_v6, %v283_v5  ;;  %v315_v9 = vld [vmem:[%s2077_s1 + $0x100] sm:$0xff] (!%p241_p9)  ;;  %v316_v10 = vld [vmem:[%s2077_s1 + $0x108] sm:$0xff] (!%p241_p9)  ;;  %1269 = vmatprep.subr.bf16.mxu0 (!%p241_p9), %v1268_v3  ;;  %v334_v15 = vld [vmem:[%s2077_s1 + $0x198] sm:$0xff] (!%p241_p9)  ;;  %s1399_s17 = smul.u32 (!%p241_p9), 768, %s1577_s28  ;;  %s1515_s29 = smov (!%p241_p9), [#allocation2]  }
  0x11   : > { %v1302_v12 = vpack.c.bf16 (!%p241_p9), %v316_v10, %v315_v9  ;;  %1301 = vmatprep.subr.bf16.mxu1 (!%p241_p9), %v1300_v7  ;;  %v1304_v17 = vpack.c.bf16 (!%p241_p9), %v334_v15, %v333_v14  ;;  %v285_v18 = vld [vmem:[%s2077_s1 + $0x10] sm:$0xff] (!%p241_p9)  ;;  %v286_v19 = vld [vmem:[%s2077_s1 + $0x18] sm:$0xff] (!%p241_p9)  ;;  %v303_v23 = vld [vmem:[%s2077_s1 + $0xa0] sm:$0xff] (!%p241_p9)  ;;  %s1451_s8 = sshll.u32 (!%p241_p9), %s1515_s29, 4  ;;  %s1452_s8 = int_to_ptr.vmem [resolvable:$false] %s1451_s8 }
  0x12   : > { %1271 = vmatpush3.bf16.msra.mxu0 (!%p241_p9), %v1270_v8  ;;  %v317_v20 = vld [vmem:[%s2077_s1 + $0x110] sm:$0xff] (!%p241_p9)  ;;  %v1274_v21 = vpack.c.bf16 (!%p241_p9), %v286_v19, %v285_v18  ;;  %v318_v22 = vld [vmem:[%s2077_s1 + $0x118] sm:$0xff] (!%p241_p9)  ;;  %v304_v24 = vld [vmem:[%s2077_s1 + $0xa8] sm:$0xff] (!%p241_p9)  ;;  %s2034_s22 = scalar_lea.hbm (!%p241_p9), %s2083_s7, %s1399_s17  ;;  %s1453_s9 = scalar_lea.vmem (!%p241_p9), %s1452_s8, 1536 }
  0x13   : > { %1303 = vmatpush3.bf16.msra.mxu1 (!%p241_p9), %v1302_v12  ;;  %1273 = vmatprep.subr.bf16.mxu0 (!%p241_p9), %v1272_v16  ;;  %v1306_v25 = vpack.c.bf16 (!%p241_p9), %v318_v22, %v317_v20  ;;  %v1276_v26 = vpack.c.bf16 (!%p241_p9), %v304_v24, %v303_v23  ;;  %v335_v27 = vld [vmem:[%s2077_s1 + $0x1a0] sm:$0xff] (!%p241_p9)  ;;  %v336_v28 = vld [vmem:[%s2077_s1 + $0x1a8] sm:$0xff] (!%p241_p9)  ;;  %v305_v35 = vld [vmem:[%s2077_s1 + $0xb0] sm:$0xff] (!%p241_p9) }
  0x14   : > { %1305 = vmatprep.subr.bf16.mxu1 (!%p241_p9), %v1304_v17  ;;  %v287_v29 = vld [vmem:[%s2077_s1 + $0x20] sm:$0xff] (!%p241_p9)  ;;  %v1308_v30 = vpack.c.bf16 (!%p241_p9), %v336_v28, %v335_v27  ;;  %v288_v31 = vld [vmem:[%s2077_s1 + $0x28] sm:$0xff] (!%p241_p9)  ;;  %v306_v36 = vld [vmem:[%s2077_s1 + $0xb8] sm:$0xff] (!%p241_p9) }
  0x15   : > { %v319_v32 = vld [vmem:[%s2077_s1 + $0x120] sm:$0xff]  ;;  %v320_v33 = vld [vmem:[%s2077_s1 + $0x128] sm:$0xff]  ;;  %v1278_v34 = vpack.c.bf16 %v288_v31, %v287_v29  ;;  %v337_v37 = vld [vmem:[%s2077_s1 + $0x1b0] sm:$0xff]  ;;  %v1280_v39 = vpack.c.bf16 %v306_v36, %v305_v35  ;;  %s1707_s23 = scalar_select %p272_p10, %s1577_s28, 1 }
  0x16   : > { %1275 = vmatpush3.bf16.msra.mxu0 %v1274_v21  ;;  %v1310_v38 = vpack.c.bf16 %v320_v33, %v319_v32  ;;  %v338_v40 = vld [vmem:[%s2077_s1 + $0x1b8] sm:$0xff]  ;;  %v289_v41 = vld [vmem:[%s2077_s1 + $0x30] sm:$0xff]  ;;  %v307_v46 = vld [vmem:[%s2077_s1 + $0xc0] sm:$0xff]  ;;  %s1030_s28 = scalar_lea.sflag [#allocation3], %s269_s16 }
  0x17   : > { %1307 = vmatpush3.bf16.msra.mxu1 %v1306_v25  ;;  %1277 = vmatprep.subr.bf16.mxu0 %v1276_v26  ;;  %v290_v42 = vld [vmem:[%s2077_s1 + $0x38] sm:$0xff]  ;;  %v1312_v43 = vpack.c.bf16 %v338_v40, %v337_v37  ;;  %v321_v44 = vld [vmem:[%s2077_s1 + $0x130] sm:$0xff]  ;;  %v308_v47 = vld [vmem:[%s2077_s1 + $0xc8] sm:$0xff]  ;;  %s1398_s15 = smul.u32 48, %s1707_s23 }
  0x18   : > { %1309 = vmatprep.subr.bf16.mxu1 %v1308_v30  ;;  %v322_v45 = vld [vmem:[%s2077_s1 + $0x138] sm:$0xff]  ;;  %v339_v48 = vld [vmem:[%s2077_s1 + $0x1c0] sm:$0xff]  ;;  %v340_v49 = vld [vmem:[%s2077_s1 + $0x1c8] sm:$0xff]  ;;  %v1282_v50 = vpack.c.bf16 %v290_v42, %v289_v41  ;;  %v1284_v52 = vpack.c.bf16 %v308_v47, %v307_v46 }
  0x19   : > { %v1314_v51 = vpack.c.bf16 %v322_v45, %v321_v44  ;;  %v291_v53 = vld [vmem:[%s2077_s1 + $0x40] sm:$0xff]  ;;  %v292_v54 = vld [vmem:[%s2077_s1 + $0x48] sm:$0xff]  ;;  %v1316_v56 = vpack.c.bf16 %v340_v49, %v339_v48  ;;  %v309_v58 = vld [vmem:[%s2077_s1 + $0xd0] sm:$0xff]  ;;  %s1764_s21 = scalar_lea.vmem %s2076_s0, %s1398_s15 }
  0x1a   : > { %1279 = vmatpush3.bf16.msra.mxu0 %v1278_v34  ;;  %v323_v55 = vld [vmem:[%s2077_s1 + $0x140] sm:$0xff]  ;;  %v324_v57 = vld [vmem:[%s2077_s1 + $0x148] sm:$0xff]  ;;  %v310_v59 = vld [vmem:[%s2077_s1 + $0xd8] sm:$0xff]  ;;  %v1286_v62 = vpack.c.bf16 %v292_v54, %v291_v53 }
  0x1b   : > { %1311 = vmatpush3.bf16.msra.mxu1 %v1310_v38  ;;  %1281 = vmatprep.subr.bf16.mxu0 %v1280_v39  ;;  %v341_v60 = vld [vmem:[%s2077_s1 + $0x1d0] sm:$0xff]  ;;  %v342_v61 = vld [vmem:[%s2077_s1 + $0x1d8] sm:$0xff]  ;;  %v1318_v63 = vpack.c.bf16 %v324_v57, %v323_v55  ;;  %v1288_v0 = vpack.c.bf16 %v310_v59, %v309_v58  ;;  %v311_v6 = vld [vmem:[%s2077_s1 + $0xe0] sm:$0xff] }
  0x1c   : > { %1313 = vmatprep.subr.bf16.mxu1 %v1312_v43  ;;  %v293_v1 = vld [vmem:[%s2077_s1 + $0x50] sm:$0xff]  ;;  %v294_v2 = vld [vmem:[%s2077_s1 + $0x58] sm:$0xff]  ;;  %v1320_v4 = vpack.c.bf16 %v342_v61, %v341_v60  ;;  %v312_v7 = vld [vmem:[%s2077_s1 + $0xe8] sm:$0xff] }
  0x1d   : > { %v325_v3 = vld [vmem:[%s2077_s1 + $0x150] sm:$0xff]  ;;  %v326_v5 = vld [vmem:[%s2077_s1 + $0x158] sm:$0xff]  ;;  %v343_v8 = vld [vmem:[%s2077_s1 + $0x1e0] sm:$0xff]  ;;  %v1290_v10 = vpack.c.bf16 %v294_v2, %v293_v1  ;;  %v1292_v14 = vpack.c.bf16 %v312_v7, %v311_v6 }
  0x1e   : > { %1283 = vmatpush3.bf16.msra.mxu0 %v1282_v50  ;;  %v344_v9 = vld [vmem:[%s2077_s1 + $0x1e8] sm:$0xff]  ;;  %v295_v11 = vld [vmem:[%s2077_s1 + $0x60] sm:$0xff]  ;;  %v1322_v13 = vpack.c.bf16 %v326_v5, %v325_v3  ;;  %v1785_v17 = vld [vmem:[%s1764_s21 + $0x18] sm:$0xff] }
  0x1f   : > { %1315 = vmatpush3.bf16.msra.mxu1 %v1314_v51  ;;  %1285 = vmatprep.subr.bf16.mxu0 %v1284_v52  ;;  %v296_v12 = vld [vmem:[%s2077_s1 + $0x68] sm:$0xff]  ;;  %v327_v15 = vld [vmem:[%s2077_s1 + $0x160] sm:$0xff]  ;;  %v1324_v18 = vpack.c.bf16 %v344_v9, %v343_v8  ;;  %v313_v20 = vld [vmem:[%s2077_s1 + $0xf0] sm:$0xff] }
  0x20   : > { %1317 = vmatprep.subr.bf16.mxu1 %v1316_v56  ;;  %v1782_v16 = vld [vmem:[%s1764_s21 + $0x8] sm:$0xff]  ;;  %v314_v21 = vld [vmem:[%s2077_s1 + $0xf8] sm:$0xff]  ;;  %v345_v22 = vld [vmem:[%s2077_s1 + $0x1f0] sm:$0xff]  ;;  %513 = vmatprep.mubr.f32.mxu1 %v1785_v17  ;;  %v1294_v24 = vpack.c.bf16 %v296_v12, %v295_v11 }
  0x21   : > { %v328_v19 = vld [vmem:[%s2077_s1 + $0x168] sm:$0xff]  ;;  %443 = vmatprep.mubr.f32.mxu0 %v1782_v16  ;;  %v346_v23 = vld [vmem:[%s2077_s1 + $0x1f8] sm:$0xff]  ;;  %v1296_v26 = vpack.c.bf16 %v314_v21, %v313_v20  ;;  %v297_v27 = vld [vmem:[%s2077_s1 + $0x70] sm:$0xff] }
  0x22   : > { %1287 = vmatpush3.bf16.msra.mxu0 %v1286_v62  ;;  %v1326_v25 = vpack.c.bf16 %v328_v19, %v327_v15  ;;  %v298_v28 = vld [vmem:[%s2077_s1 + $0x78] sm:$0xff]  ;;  %v329_v29 = vld [vmem:[%s2077_s1 + $0x170] sm:$0xff]  ;;  %v1328_v30 = vpack.c.bf16 %v346_v23, %v345_v22  ;;  %v363_v32 = vld [vmem:[%s2077_s1 + $0x280] sm:$0xff] }
  0x23   : > { %1319 = vmatpush3.bf16.msra.mxu1 %v1318_v63  ;;  %1289 = vmatprep.subr.bf16.mxu0 %v1288_v0  ;;  %v330_v31 = vld [vmem:[%s2077_s1 + $0x178] sm:$0xff]  ;;  %v364_v33 = vld [vmem:[%s2077_s1 + $0x288] sm:$0xff]  ;;  %v1298_v34 = vpack.c.bf16 %v298_v28, %v297_v27  ;;  %v347_v37 = vld [vmem:[%s2077_s1 + $0x200] sm:$0xff]  ;;  %v1511_v27 = vmov 0.0|0.0  }
  0x24   : > { %1321 = vmatprep.subr.bf16.mxu1 %v1320_v4  ;;  %v1330_v35 = vpack.c.bf16 %v330_v31, %v329_v29  ;;  %v1332_v36 = vpack.c.bf16 %v364_v33, %v363_v32  ;;  %v348_v38 = vld [vmem:[%s2077_s1 + $0x208] sm:$0xff]  ;;  %v365_v39 = vld [vmem:[%s2077_s1 + $0x290] sm:$0xff]  ;;  %v366_v40 = vld [vmem:[%s2077_s1 + $0x298] sm:$0xff] }
  0x25   : > { %v1835_v41 = vld [vmem:[%s1764_s21] sm:$0xff]  ;;  %v1334_v42 = vpack.c.bf16 %v348_v38, %v347_v37  ;;  %v1838_v43 = vld [vmem:[%s1764_s21 + $0x10] sm:$0xff]  ;;  %v1336_v44 = vpack.c.bf16 %v366_v40, %v365_v39  ;;  %v350_v46 = vld [vmem:[%s2077_s1 + $0x218] sm:$0xff]  ;;  %v1513_v37 = vmov 0.0  }
  0x26   : > { %1291 = vmatpush3.bf16.msra.mxu0 %v1290_v10  ;;  %v349_v45 = vld [vmem:[%s2077_s1 + $0x210] sm:$0xff]  ;;  %v367_v47 = vld [vmem:[%s2077_s1 + $0x2a0] sm:$0xff]  ;;  %v368_v48 = vld [vmem:[%s2077_s1 + $0x2a8] sm:$0xff] }
  0x27   : > { %1323 = vmatpush3.bf16.msra.mxu1 %v1322_v13  ;;  %1293 = vmatprep.subr.bf16.mxu0 %v1292_v14  ;;  %v1853_v49 = vld [vmem:[%s1764_s21 + $0x28] sm:$0xff]  ;;  %v1338_v50 = vpack.c.bf16 %v350_v46, %v349_v45  ;;  %v1340_v51 = vpack.c.bf16 %v368_v48, %v367_v47  ;;  %v351_v52 = vld [vmem:[%s2077_s1 + $0x220] sm:$0xff]  ;;  %v369_v54 = vld [vmem:[%s2077_s1 + $0x2b0] sm:$0xff] }
  0x28   : > { %1325 = vmatprep.subr.bf16.mxu1 %v1324_v18  ;;  %v352_v53 = vld [vmem:[%s2077_s1 + $0x228] sm:$0xff]  ;;  %v370_v55 = vld [vmem:[%s2077_s1 + $0x2b8] sm:$0xff]  ;;  %v353_v58 = vld [vmem:[%s2077_s1 + $0x230] sm:$0xff] }
  0x29   : > { %v1342_v56 = vpack.c.bf16 %v352_v53, %v351_v52  ;;  %v1344_v57 = vpack.c.bf16 %v370_v55, %v369_v54  ;;  %v354_v59 = vld [vmem:[%s2077_s1 + $0x238] sm:$0xff]  ;;  %v371_v60 = vld [vmem:[%s2077_s1 + $0x2c0] sm:$0xff]  ;;  %v372_v61 = vld [vmem:[%s2077_s1 + $0x2c8] sm:$0xff] }
  0x2a   : > { %1295 = vmatpush3.bf16.msra.mxu0 %v1294_v24  ;;  %v1346_v62 = vpack.c.bf16 %v354_v59, %v353_v58  ;;  %v1348_v63 = vpack.c.bf16 %v372_v61, %v371_v60  ;;  %v355_v0 = vld [vmem:[%s2077_s1 + $0x240] sm:$0xff]  ;;  %v356_v1 = vld [vmem:[%s2077_s1 + $0x248] sm:$0xff]  ;;  %v373_v2 = vld [vmem:[%s2077_s1 + $0x2d0] sm:$0xff] }
  0x2b   : > { %1327 = vmatpush3.bf16.msra.mxu1 %v1326_v25  ;;  %1297 = vmatprep.subr.bf16.mxu0 %v1296_v26  ;;  %v374_v3 = vld [vmem:[%s2077_s1 + $0x2d8] sm:$0xff]  ;;  %v1350_v4 = vpack.c.bf16 %v356_v1, %v355_v0  ;;  %v357_v6 = vld [vmem:[%s2077_s1 + $0x250] sm:$0xff]  ;;  %v375_v8 = vld [vmem:[%s2077_s1 + $0x2e0] sm:$0xff] }
  0x2c   : > { %1329 = vmatprep.subr.bf16.mxu1 %v1328_v30  ;;  %v1352_v5 = vpack.c.bf16 %v374_v3, %v373_v2  ;;  %v358_v7 = vld [vmem:[%s2077_s1 + $0x258] sm:$0xff]  ;;  %v376_v9 = vld [vmem:[%s2077_s1 + $0x2e8] sm:$0xff]  ;;  %v359_v12 = vld [vmem:[%s2077_s1 + $0x260] sm:$0xff] }
  0x2d   : > { %v1354_v10 = vpack.c.bf16 %v358_v7, %v357_v6  ;;  %v1356_v11 = vpack.c.bf16 %v376_v9, %v375_v8  ;;  %v360_v13 = vld [vmem:[%s2077_s1 + $0x268] sm:$0xff]  ;;  %v377_v14 = vld [vmem:[%s2077_s1 + $0x2f0] sm:$0xff]  ;;  %v378_v15 = vld [vmem:[%s2077_s1 + $0x2f8] sm:$0xff] }
  0x2e   : > { %1299 = vmatpush3.bf16.msra.mxu0 %v1298_v34  ;;  %v1358_v18 = vpack.c.bf16 %v360_v13, %v359_v12  ;;  %v1360_v19 = vpack.c.bf16 %v378_v15, %v377_v14  ;;  %v361_v20 = vld [vmem:[%s2077_s1 + $0x270] sm:$0xff]  ;;  %v362_v21 = vld [vmem:[%s2077_s1 + $0x278] sm:$0xff]  ;;  %v1925_v23 = vld [vmem:[%s1764_s21 + $0x20] sm:$0xff]  ;;  %s1397_s21 = smul.u32 48, %s269_s16 }
  0x2f   : > { %1331 = vmatpush3.bf16.msra.mxu1 %v1330_v35  ;;  %1333 = vmatprep.subr.bf16.mxu0 %v1332_v36  ;;  %v1362_v22 = vpack.c.bf16 %v362_v21, %v361_v20  ;;  %v589_v24 = vld [vmem:[%s2078_s2] sm:$0xff]  ;;  %v590_v25 = vld [vmem:[%s2078_s2 + $0x8] sm:$0xff]  ;;  %v591_v26 = vld [vmem:[%s2078_s2 + $0x10] sm:$0xff] }
  0x30   : > { %1364 = vmatprep.subr.bf16.mxu1 %v1511_v27  ;;  %v1365_v28 = vpack.c.bf16 %v590_v25, %v589_v24  ;;  %v592_v29 = vld [vmem:[%s2078_s2 + $0x18] sm:$0xff]  ;;  %v593_v31 = vld [vmem:[%s2078_s2 + $0x20] sm:$0xff]  ;;  %v594_v32 = vld [vmem:[%s2078_s2 + $0x28] sm:$0xff]  ;;  %s271_s15 = scalar_lea.vmem [#allocation2], %s1397_s21 }
  0x31   : > { %444 = vmatmul.mubr.f32.vlgmr.msra.gmra.mrb[0].mxu0 %v1835_v41  ;;  %v1368_v30 = vpack.c.bf16 %v592_v29, %v591_v26  ;;  %v1371_v33 = vpack.c.bf16 %v594_v32, %v593_v31  ;;  %v595_v34 = vld [vmem:[%s2078_s2 + $0x30] sm:$0xff]  ;;  %v596_v35 = vld [vmem:[%s2078_s2 + $0x38] sm:$0xff]  ;;  %v679_v52 = vld [vmem:[%s2080_s4] sm:$0xff]  ;;  %s1044_s18 = sshll.u32 %s271_s15, 4  ;;  %s2036_s18 = int_to_ptr.vmem [resolvable:$true] %s1044_s18 }
  0x32   : > { %514 = vmatmul.mubr.f32.vlgmr.msra.gmra.mrb[0].mxu1 %v1838_v43  ;;  %1335 = vmatpush3.bf16.msra.mxu0 %v1334_v42  ;;  %v1374_v36 = vpack.c.bf16 %v596_v35, %v595_v34  ;;  %v680_v53 = vld [vmem:[%s2080_s4 + $0x8] sm:$0xff]  ;;  %v1108_v55 = vld [vmem:[%s2079_s3] ss:$0 sm:$0xff]  ;;  %v776_v61 = vld [vmem:[%s2082_s6 + $0x38] sm:$0xf]  ;;  %s1447_s23 = scalar_lea.vmem %s2036_s18, 768  ;;  %p1454_p0 = scmp.lt.s32.totalorder %s2036_s18, %s1452_s8 }
  0x33   : > { %1337 = vmatprep.subr.bf16.mxu0 %v1336_v44  ;;  %583 = vmatprep.mubr.f32.mxu0 %v1853_v49  ;;  %v1377_v54 = vpack.c.bf16 %v680_v53, %v679_v52  ;;  %v770_v60 = vld [vmem:[%s2082_s6 + $0x8] sm:$0xff]  ;;  %v775_v0 = vld [vmem:[%s2082_s6 + $0x30] sm:$0xf]  ;;  %vm1978_vm5 = vmpackc.low %vm785_vm3, %vm1514_vm4  ;;  %p1448_p11 = scmp.ne.s32.totalorder %s2036_s18, %s1447_s23  ;;  %p1455_p1 = scmp.lt.s32.totalorder %s1453_s9, %s1447_s23 }
  0x34   : > { %1366 = vmatpush3.bf16.msra.mxu1 %v1365_v28  ;;  %1258 = vmatprep.mubr.msk.f32.mxu1 %vm1512_vm0, %v1513_v37  ;;  %v772_v3 = vld [vmem:[%s2082_s6 + $0x18] sm:$0xff]  ;;  %v1110_v6 = vld [vmem:[%s2081_s5] ss:$0 sm:$0xff]  ;;  %v771_v13 = vld [vmem:[%s2082_s6 + $0x10] sm:$0xff] }
  0x35   : > { %1367 = vmatprep.subr.bf16.mxu1 %v1511_v27  ;;  %v777_v14 = vld [vmem:[%s2082_s6 + $0x40] sm:$0xf]  ;;  %v774_v15 = vld [vmem:[%s2082_s6 + $0x28] sm:$0xff]  ;;  %v779_v25 = vld [vmem:[%s2082_s6 + $0x50] sm:$0xf]  ;;  %p1449_p12 = pnand %p1448_p11, %p1594_p5  ;;  %p1456_p2 = por %p1455_p1, %p1454_p0 }
  0x36   : > { %1339 = vmatpush3.bf16.msra.mxu0 %v1338_v50  ;;  %v1388_v20 = vpack.c.bf16 %v777_v14, %v771_v13  ;;  %v773_v24 = vld [vmem:[%s2082_s6 + $0x20] sm:$0xff] }
  0x37   : > { %1341 = vmatprep.subr.bf16.mxu0 %v1340_v51  ;;  %v1394_v26 = vpack.c.bf16 %v779_v25, %v773_v24  ;;  %p1450_p13 = pneg %p1449_p12 }
  0x38   : > { %1369 = vmatpush3.bf16.msra.mxu1 %v1368_v30 }
  0x39   : > { %1370 = vmatprep.subr.bf16.mxu1 %v1511_v27  ;;  %p1457_p3 = pnand %p1456_p2, %p1450_p13 }
  0x3a   : > { %1343 = vmatpush3.bf16.msra.mxu0 %v1342_v56 }
  0x3b   : > { %1345 = vmatprep.subr.bf16.mxu0 %v1344_v57 }
  0x3c   : > { %1372 = vmatpush3.bf16.msra.mxu1 %v1371_v33 }
  0x3d   : > { %1373 = vmatprep.subr.bf16.mxu1 %v1511_v27 }
  0x3e   : > { %1347 = vmatpush3.bf16.msra.mxu0 %v1346_v62  ;;  %v1379_v62 = vpack.c.bf16 %v776_v61, %v770_v60 }
  0x3f   : > { %1349 = vmatprep.subr.bf16.mxu0 %v1348_v63  ;;  %v769_v63 = vld [vmem:[%s2082_s6] sm:$0xff] }
  0x40   : > { %1375 = vmatpush3.bf16.msra.mxu1 %v1374_v36  ;;  %v1382_v2 = vpack.c.bf16 %v775_v0, %v769_v63 }
  0x41   : > { %1376 = vmatprep.subr.bf16.mxu1 %v1511_v27 }
  0x42   : > { %1351 = vmatpush3.bf16.msra.mxu0 %v1350_v4  ;;  %v778_v4 = vld [vmem:[%s2082_s6 + $0x48] sm:$0xf] }
  0x43   : > { %1353 = vmatprep.subr.bf16.mxu0 %v1352_v5  ;;  %v1385_v5 = vpack.c.bf16 %v778_v4, %v772_v3 }
  0x46   : > { %1355 = vmatpush3.bf16.msra.mxu0 %v1354_v10 }
  0x47   : > { %1357 = vmatprep.subr.bf16.mxu0 %v1356_v11 }
  0x4a   : > { %1359 = vmatpush3.bf16.msra.mxu0 %v1358_v18  ;;  %v780_v18 = vld [vmem:[%s2082_s6 + $0x58] sm:$0xf] }
  0x4b   : > { %1361 = vmatprep.subr.bf16.mxu0 %v1360_v19 }
  0x4e   : > { %1363 = vmatpush3.bf16.msra.mxu0 %v1362_v22  ;;  %v1391_v22 = vpack.c.bf16 %v780_v18, %v774_v15 }
  0x51   : > { %584 = vmatmul.mubr.f32.vlgmr.msra.gmra.mrb[2].mxu0 %v1925_v23 }
 0x104   : > { %v1157_v38 = vpop.f32.mrb[0].mxu0 }
 0x105   : > { %v1192_v39 = vpop.f32.mrb[0].mxu1  ;;  %v1158_v40 = vpop.f32.mrb[1].mxu0 }
 0x106   : > { %v1159_v42 = vadd.f32 %v1158_v40, %v1157_v38  ;;  %v1193_v44 = vpop.f32.mrb[1].mxu1 }
 0x107   : > { %v1194_v45 = vadd.f32 %v1193_v44, %v1192_v39 }
 0x109   : > { %v516_v46 = vadd.f32 %v1194_v45, %v1159_v42 }
 0x124   : > { %v1227_v47 = vpop.f32.mrb[2].mxu0 }
 0x125   : > { %v1228_v48 = vpop.f32.mrb[3].mxu0 }
 0x126   : > { %v1229_v50 = vadd.f32 %v1228_v48, %v1227_v47 }
 0x128   : > { %v586_v51 = vadd.f32 %v1229_v50, %v516_v46 }
 0x12a   : > { %1259 = vmatmul.mubr.msk.f32.vlgmr.msra.gmra.mrb[2].mxu1 %vm604_vm1, %v586_v51 }
 0x12b   : > { %1265 = vmatprep.mubr.msk.f32.mxu1 %vm1512_vm0, %v1513_v37  ;;  %1378 = vmatpush3.bf16.msra.mxu1 %v1377_v54 }
 0x12c   : > { %1381 = vmatprep.subr.msk.bf16.mxu1 %vm1978_vm5, %v1379_v62 }
 0x1fd   : > { %v674_v56 = vpop.f32.mrb[2].mxu1 }
 0x1fe   : > { %v675_v57 = vadd.f32 %v1108_v55, %v674_v56  ;;  %v1260_v58 = vpop.f32.mrb[3].mxu1 }
 0x200   : > { %v678_v59 = vmax.f32 %v675_v57, 0.0 }
 0x202   : > { %1266 = vmatmul.mubr.msk.f32.vlgmr.msra.gmra.mrb[4].mxu1 %vm688_vm2, %v678_v59 }
 0x203   : > { %868 = vmatprep.mubr.f32.mxu1 %v1513_v37  ;;  %1384 = vmatpush1.bf16.msk.msra.mxu1 %vm1978_vm5, %v1382_v2 }
 0x204   : > { %1387 = vmatprep.subr.msk.bf16.mxu1 %vm1978_vm5, %v1385_v5 }
 0x2d5   : > { %v758_v7 = vpop.f32.mrb[4].mxu1 }
 0x2d6   : > { %v759_v8 = vadd.f32 %v1110_v6, %v758_v7  ;;  %v1267_v9 = vpop.f32.mrb[5].mxu1 }
 0x2d8   : > { %v1112_v10 = vmul.f32 -1.442695, %v759_v8 }
 0x2da   : > { %1443 = vpow2.f32 %v1112_v10 }
 0x2e4   : > { %v1444_v11 = vpop.eup %1443 }
 0x2e5   : > { %v765_v12 = vadd.f32 1.0, %v1444_v11 }
 0x2e7   : > { %1445 = vrcp.f32 %v765_v12 }
 0x2f1   : > { %v1446_v19 = vpop.eup %1445 }
 0x2f2   : > { %v768_v21 = vadd.f32 1.0, %v1446_v19 }
 0x2f4   : > { %1115 = vmatmul.mubr.msk.f32.vlgmr.msra.gmra.mrb[6].mxu1 %vm781_vm6, %v768_v21 }
 0x2f5   : > { %1390 = vmatpush1.bf16.msk.msra.mxu1 %vm1978_vm5, %v1388_v20  ;;  %939 = vmatprep.mubr.f32.mxu1 %v1513_v37 }
 0x2f6   : > { %1393 = vmatprep.subr.msk.bf16.mxu1 %vm1978_vm5, %v1391_v22 }
 0x2f8   : > { %1118 = vmatmul.mubr.msk.f32.vlgmr.msra.gmra.mrb[8].mxu1 %vm781_vm6, %v768_v21 }
 0x2f9   : > { %1396 = vmatpush1.bf16.msk.msra.mxu1 %vm1978_vm5, %v1394_v26  ;;  %1010 = vmatprep.mubr.f32.mxu1 %v1513_v37 }
 0x2fc   : > { %1121 = vmatmul.mubr.msk.f32.vlgmr.msra.gmra.mrb[10].mxu1 %vm781_vm6, %v768_v21 }
 0x3c7   : > { %v870_v27 = vpop.f32.mrb[6].mxu1 }
 0x3c8   : > { %v1017_v28 = vmul.f32 %v870_v27, %v1835_v41  ;;  %v872_v29 = vpop.f32.mrb[7].mxu1 }
 0x3c9   : > { %v1018_v30 = vmul.f32 %v872_v29, %v1782_v16 }
 0x3ca   : > { %1023 = vst [vmem:[%s271_s15] sm:$0xff] %v1017_v28 }
 0x3cb   : > { %1024 = vst [vmem:[%s271_s15 + $0x8] sm:$0xff] %v1018_v30  ;;  %v941_v31 = vpop.f32.mrb[8].mxu1 }
 0x3cc   : > { %v1019_v32 = vmul.f32 %v941_v31, %v1838_v43  ;;  %v943_v33 = vpop.f32.mrb[9].mxu1 }
 0x3cd   : > { %v1020_v34 = vmul.f32 %v943_v33, %v1785_v17 }
 0x3ce   : > { %1025 = vst [vmem:[%s271_s15 + $0x10] sm:$0xff] %v1019_v32 }
 0x3cf   : > { %1026 = vst [vmem:[%s271_s15 + $0x18] sm:$0xff] %v1020_v34  ;;  %v1012_v35 = vpop.f32.mrb[10].mxu1 }
 0x3d0   : > { %v1021_v41 = vmul.f32 %v1012_v35, %v1925_v23  ;;  %v1014_v36 = vpop.f32.mrb[11].mxu1 }
 0x3d1   : > { %v1022_v16 = vmul.f32 %v1014_v36, %v1853_v49 }
 0x3d2   : > { %1027 = vst [vmem:[%s271_s15 + $0x20] sm:$0xff] %v1021_v41 }
 0x3d3   : > { %1028 = vst [vmem:[%s271_s15 + $0x28] sm:$0xff] %v1022_v16 }
 0x3d4   : > { %1460 = shalt.err (!%p1457_p3)
}
 0x3d5   : > { %s1461_s13 = scalar_lea.hbm %s2034_s22, 768  ;;  %s1465_s21 = scalar_lea.hbm %s2083_s7, 1536 }
 0x3d6   : > { %p1462_p4 = scmp.ne.s32.totalorder %s2034_s22, %s1461_s13  ;;  %p1466_p9 = scmp.lt.u32.totalorder %s2034_s22, %s2083_s7 }
 0x3d7   : > { %p1467_p10 = scmp.lt.u32.totalorder %s1465_s21, %s1461_s13  ;;  %p1469_p12 = scmp.lt.u32.totalorder %s1461_s13, %s2034_s22 }
 0x3d8   : > { %p1463_p7 = pnand %p1462_p4, %p1594_p5 }
 0x3d9   : > { %p1468_p11 = por %p1467_p10, %p1466_p9 }
 0x3da   : > { %p1464_p8 = pneg %p1463_p7 }
 0x3db   : > { %p1470_p13 = por %p1469_p12, %p1468_p11 }
 0x3dd   : > { %p1471_p0 = pnand %p1470_p13, %p1464_p8 }
 0x3df   : > { %1474 = shalt.err (!%p1471_p0)
}
 0x3e0   : > { %1400 = dma.vmem_to_hbm [thread:$0]  (%p1594_p5), %s2036_s18, 768, %s2034_s22, %s1030_s28  }
 0x3e1 PF: > { %p1406_p1 = scmp.ge.s32.totalorder %s1509_s27, 2  ;;  %s1056_s19 = sand.u32 1, %s1497_s24  }
 0x3e2   : > { %s1057_s20 = scalar_lea.sflag [#allocation3], %s1056_s19 }
 0x3e3   : > { %p1403_p2 = pnand %p1406_p1, %p1598_p6 }
 0x3e5   : > { %1492 = dma.done.wait (!%p1403_p2), %s1057_s20, 768  }
 0x3e6   : > { %1494 = vsyncadd (!%p1403_p2), %s1057_s20, 4294966528  ;;  %p17_p3 = scmp.ge.s32.totalorder %s1581_s30, 4   ;;  %s2088_s24 = smov %s1501_s25 }
 0x3e7   : > { %s2089_s25 = smov %s1505_s26  ;;  %s2090_s26 = smov %s1592_s10 }
 0x3e8   : > { %s2091_s27 = smov %s1581_s30  ;;  %19 = sbr.rel (!%p17_p3) target bundleno = 3 (0x3), region = 83 }
 0x3ef   :  { %1062 = vsyncpa [#allocation3], 1 }
 0x3f0   :  { %1064 = vsyncpa [#allocation3 + $0x1], 1 }

</bundles_post_ra>
